<compile_context>
chip_gen: v5e
topology: v5e:2x2
jax: 0.10.0
libtpu: 0.0.40
codegen_flags: <defaults>
</compile_context>

<pallas_src>
import jax
import jax.numpy as jnp
from jax import lax
from jax.experimental import pallas as pl
from jax.experimental.pallas import tpu as pltpu


def _residual_linear_kernel(x_ref, w_ref, b_ref, o_ref, acc_ref):
    # x_ref:   (TM, TK)   X block for the contraction (also the residual at k == j)
    # w_ref:   (TN, TK)   W block, PyTorch (out_features, in_features) layout
    # b_ref:   (1,  TN)   bias block
    # o_ref:   (TM, TN)   output block
    # acc_ref: (TM, TN)   f32 VMEM accumulator (persists across the K axis)
    j = pl.program_id(1)
    k = pl.program_id(2)

    @pl.when(k == 0)
    def _():
        # Fold the bias into accumulator init (the zero-fill pass was paid anyway).
        acc_ref[...] = jnp.broadcast_to(
            b_ref[...].astype(jnp.float32), acc_ref.shape)

    # Residual fold: TILE_N == TILE_K, so at k == j this X block is exactly the
    # X block aligned with the output tile.  Added in f32 (single downcast later).
    @pl.when(k == j)
    def _():
        acc_ref[...] += x_ref[...].astype(jnp.float32)

    # x @ W^T: contract dim 1 of both operands (W kept in (out, in) layout),
    # MXU accumulates in f32.
    acc_ref[...] += lax.dot_general(
        x_ref[...], w_ref[...],
        dimension_numbers=(((1,), (1,)), ((), ())),
        preferred_element_type=jnp.float32)

    @pl.when(k == pl.num_programs(2) - 1)
    def _():
        o_ref[...] = acc_ref[...].astype(o_ref.dtype)


def _round_up(x, m):
    return (x + m - 1) // m * m


def _largest_dividing_tile(hp, desired):
    """Largest multiple of 128 that divides hp and is <= desired (hp % 128 == 0)."""
    t = max(min(desired, hp) // 128 * 128, 128)
    while hp % t != 0:
        t -= 128
    return t


def _default_tiles():
    """Generation-aware defaults.  tn == tk is required so the residual block
    coincides with the matmul LHS block at k == j."""
    vmem = 128 * 1024 * 1024
    try:
        vmem = pltpu.get_tpu_info().vmem_capacity_bytes
    except Exception:
        pass
    if vmem >= 100 * 1024 * 1024:   # v5e / v6e: 128 MiB VMEM
        return 2048, 512, 512
    return 1024, 512, 512           # v7x: 64 MiB VMEM per TensorCore


def residual_linear(x, w, b, *, tm=None, tn=None, tk=None,
                    vmem_limit_bytes=48 * 1024 * 1024):
    """out = x + (x @ w.T + b), PyTorch nn.Linear semantics.

    x: (B, S, H)   w: (H_out, H_in) = (H, H)   b: (H,)
    """
    B, S, H = x.shape
    R = B * S
    dtype = x.dtype
    x2 = x.reshape(R, H)

    d_tm, d_tn, d_tk = _default_tiles()
    tm = tm or d_tm
    tn = tn or d_tn
    tk = tk or d_tk

    # ---- hardware-friendly tile sizes --------------------------------------
    Hp = _round_up(H, 128)                              # lane-dense feature dim
    tile_nk = _largest_dividing_tile(Hp, min(tn, tk))   # TILE_N == TILE_K (residual fusion)

    # Minimum sublane tile: 8 for 32-bit, 16 for packed 16-bit outputs.
    sub = 8 if jnp.dtype(dtype).itemsize >= 4 else 16
    tile_m = _round_up(max(min(tm, _round_up(R, sub)), sub), sub)

    # ---- pad only the feature/K dim (exact zeros), never the rows ----------
    pad_h = Hp - H
    if pad_h:
        # TODO(synk): in a real module, pad/prepack W and b once at init instead of per call.
        x2 = jnp.pad(x2, ((0, 0), (0, pad_h)))
        w = jnp.pad(w, ((0, pad_h), (0, pad_h)))
        b = jnp.pad(b, ((0, pad_h),))
    b2 = b.reshape(1, Hp)

    grid = (pl.cdiv(R, tile_m), Hp // tile_nk, Hp // tile_nk)

    out = pl.pallas_call(
        _residual_linear_kernel,
        out_shape=jax.ShapeDtypeStruct((R, Hp), dtype),
        grid=grid,
        in_specs=[
            pl.BlockSpec((tile_m, tile_nk), lambda i, j, k: (i, k)),    # X
            pl.BlockSpec((tile_nk, tile_nk), lambda i, j, k: (j, k)),   # W (out, in)
            pl.BlockSpec((1, tile_nk), lambda i, j, k: (0, j)),         # bias
        ],
        out_specs=pl.BlockSpec((tile_m, tile_nk), lambda i, j, k: (i, j)),
        scratch_shapes=[pltpu.VMEM((tile_m, tile_nk), jnp.float32)],
        compiler_params=pltpu.CompilerParams(
            dimension_semantics=("parallel", "parallel", "arbitrary"),
            vmem_limit_bytes=vmem_limit_bytes),
    )(x2, w, b2)

    if pad_h:
        out = out[:, :H]
    return out.reshape(B, S, H)


if __name__ == "__main__":
    key = jax.random.PRNGKey(0)
    kx, kw, kb = jax.random.split(key, 3)

    B, S, H = 2, 8, 32
    x = jax.random.normal(kx, (B, S, H), dtype=jnp.float32)

    # Deterministic "nn.Linear(H, H)" parameters (uniform like PyTorch default init).
    bound = 1.0 / (H ** 0.5)
    w = jax.random.uniform(kw, (H, H), minval=-bound, maxval=bound, dtype=jnp.float32)  # (out, in)
    b = jax.random.uniform(kb, (H,), minval=-bound, maxval=bound, dtype=jnp.float32)

    out = residual_linear(x, w, b)
    jax.block_until_ready(out)

    # Reference check (plain JAX)
    ref = x + (x @ w.T + b)
    assert jnp.allclose(out, ref, atol=2e-5, rtol=2e-5), "mismatch vs reference"

    print("KERNEL_OK")
</pallas_src>

<mosaic_0001>
module attributes {stable_mosaic.version = 11 : i64} {
  func.func @_residual_linear_kernel(%arg0: i32, %arg1: i32, %arg2: i32, %arg3: memref<16x128xf32, #tpu.memory_space<vmem>>, %arg4: memref<128x128xf32, #tpu.memory_space<vmem>>, %arg5: memref<1x128xf32, #tpu.memory_space<vmem>>, %arg6: memref<16x128xf32, #tpu.memory_space<vmem>>, %arg7: memref<16x128xf32, #tpu.memory_space<vmem>>) attributes {dimension_semantics = [#tpu.dimension_semantics<parallel>, #tpu.dimension_semantics<parallel>, #tpu.dimension_semantics<arbitrary>], iteration_bounds = array<i64: 1, 1, 1>, scalar_prefetch = 0 : i64, scratch_operands = 1 : i64, tpu.core_type = #tpu.core_type<tc>, window_params = [{transform_indices = @transform_0, window_bounds = array<i64: 16, 128>}, {transform_indices = @transform_1, window_bounds = array<i64: 128, 128>}, {transform_indices = @transform_2, window_bounds = array<i64: 1, 128>}, {transform_indices = @transform_3, window_bounds = array<i64: 16, 128>}]} {
    %c0_i32 = arith.constant 0 : i32
    %0 = arith.cmpi eq, %arg2, %c0_i32 : i32
    %1 = arith.extui %0 : i1 to i32
    %c0_i32_0 = arith.constant 0 : i32
    %2 = arith.cmpi ne, %1, %c0_i32_0 : i32
    scf.if %2 {
      %c0_11 = arith.constant 0 : index
      %c0_12 = arith.constant 0 : index
      %15 = vector.load %arg5[%c0_11, %c0_12] : memref<1x128xf32, #tpu.memory_space<vmem>>, vector<1x128xf32>
      %16 = vector.shape_cast %15 : vector<1x128xf32> to vector<1x128xf32>
      %17 = vector.broadcast %16 : vector<1x128xf32> to vector<16x128xf32>
      %c0_13 = arith.constant 0 : index
      %c0_14 = arith.constant 0 : index
      %18 = vector.load %arg7[%c0_13, %c0_14] : memref<16x128xf32, #tpu.memory_space<vmem>>, vector<16x128xf32>
      tpu.vector_store %arg7[%c0_13, %c0_14], %17 {strides = array<i32>} : memref<16x128xf32, #tpu.memory_space<vmem>>, vector<16x128xf32>,
    } else {
    }
    %3 = arith.cmpi eq, %arg2, %arg1 : i32
    %4 = arith.extui %3 : i1 to i32
    %c0_i32_1 = arith.constant 0 : i32
    %5 = arith.cmpi ne, %4, %c0_i32_1 : i32
    scf.if %5 {
      %c0_11 = arith.constant 0 : index
      %c0_12 = arith.constant 0 : index
      %15 = vector.load %arg7[%c0_11, %c0_12] : memref<16x128xf32, #tpu.memory_space<vmem>>, vector<16x128xf32>
      %c0_13 = arith.constant 0 : index
      %c0_14 = arith.constant 0 : index
      %16 = vector.load %arg3[%c0_13, %c0_14] : memref<16x128xf32, #tpu.memory_space<vmem>>, vector<16x128xf32>
      %17 = arith.addf %15, %16 : vector<16x128xf32>
      %c0_15 = arith.constant 0 : index
      %c0_16 = arith.constant 0 : index
      %18 = vector.load %arg7[%c0_15, %c0_16] : memref<16x128xf32, #tpu.memory_space<vmem>>, vector<16x128xf32>
      tpu.vector_store %arg7[%c0_15, %c0_16], %17 {strides = array<i32>} : memref<16x128xf32, #tpu.memory_space<vmem>>, vector<16x128xf32>,
    } else {
    }
    %c0 = arith.constant 0 : index
    %c0_2 = arith.constant 0 : index
    %6 = vector.load %arg7[%c0, %c0_2] : memref<16x128xf32, #tpu.memory_space<vmem>>, vector<16x128xf32>
    %c0_3 = arith.constant 0 : index
    %c0_4 = arith.constant 0 : index
    %7 = vector.load %arg3[%c0_3, %c0_4] : memref<16x128xf32, #tpu.memory_space<vmem>>, vector<16x128xf32>
    %c0_5 = arith.constant 0 : index
    %c0_6 = arith.constant 0 : index
    %8 = vector.load %arg4[%c0_5, %c0_6] : memref<128x128xf32, #tpu.memory_space<vmem>>, vector<128x128xf32>
    %cst = arith.constant dense<0.000000e+00> : vector<16x128xf32>
    %9 = tpu.matmul %7, %8, %cst {dimension_numbers = #tpu.dot_dimension_numbers<[1], [1], [0], [0], [0, 0, 1, 0], [], []>} : vector<16x128xf32>, vector<128x128xf32>, vector<16x128xf32> -> vector<16x128xf32>
    %10 = arith.addf %6, %9 : vector<16x128xf32>
    %c0_7 = arith.constant 0 : index
    %c0_8 = arith.constant 0 : index
    %11 = vector.load %arg7[%c0_7, %c0_8] : memref<16x128xf32, #tpu.memory_space<vmem>>, vector<16x128xf32>
    tpu.vector_store %arg7[%c0_7, %c0_8], %10 {strides = array<i32>} : memref<16x128xf32, #tpu.memory_space<vmem>>, vector<16x128xf32>,
    %c0_i32_9 = arith.constant 0 : i32
    %12 = arith.cmpi eq, %arg2, %c0_i32_9 : i32
    %13 = arith.extui %12 : i1 to i32
    %c0_i32_10 = arith.constant 0 : i32
    %14 = arith.cmpi ne, %13, %c0_i32_10 : i32
    scf.if %14 {
      %c0_11 = arith.constant 0 : index
      %c0_12 = arith.constant 0 : index
      %15 = vector.load %arg7[%c0_11, %c0_12] : memref<16x128xf32, #tpu.memory_space<vmem>>, vector<16x128xf32>
      %c0_13 = arith.constant 0 : index
      %c0_14 = arith.constant 0 : index
      %16 = vector.load %arg6[%c0_13, %c0_14] : memref<16x128xf32, #tpu.memory_space<vmem>>, vector<16x128xf32>
      tpu.vector_store %arg6[%c0_13, %c0_14], %15 {strides = array<i32>} : memref<16x128xf32, #tpu.memory_space<vmem>>, vector<16x128xf32>,
    } else {
    }
    return
  }
  func.func @transform_0(%arg0: i32, %arg1: i32, %arg2: i32) -> (i32, i32) {
    %c0_i32 = arith.constant 0 : i32
    return %arg0, %arg2 : i32, i32
  }
  func.func @transform_1(%arg0: i32, %arg1: i32, %arg2: i32) -> (i32, i32) {
    %c0_i32 = arith.constant 0 : i32
    return %arg1, %arg2 : i32, i32
  }
  func.func @transform_2(%arg0: i32, %arg1: i32, %arg2: i32) -> (i32, i32) {
    %c0_i32 = arith.constant 0 : i32
    %c0_i32_0 = arith.constant 0 : i32
    return %c0_i32, %arg1 : i32, i32
  }
  func.func @transform_3(%arg0: i32, %arg1: i32, %arg2: i32) -> (i32, i32) {
    %c0_i32 = arith.constant 0 : i32
    return %arg0, %arg1 : i32, i32
  }
}

</mosaic_0001>

<bundles_post_ra>
// kernel: tpu_custom_call.1
= control target key start
LH: loop header
LB: loop body
LE: loop exit
PB: predicated region body
PF: predicated region fallthrough
CT: control target
= control target key end

     0   :  { %8 = vsyncpa [#allocation4], 0  ;;  %s289_s0 = inlined_call_operand.hbm [shape: f32[16,128], index: 0, kind: input, shape index: {}]   ;;  %s290_s1 = inlined_call_operand.hbm [shape: f32[128,128], index: 1, kind: input, shape index: {}]   ;;  %s291_s2 = inlined_call_operand.vmem [shape: f32[1,128], index: 2, kind: input, shape index: {}]   ;;  %s292_s3 = inlined_call_operand.hbm [shape: f32[16,128], index: 3, kind: output, shape index: {}]  }
   0x1   :  { %9 = vsyncpa [#allocation7], 0 }
   0x2   :  { %10 = vsyncpa [#allocation5], 0  ;;  %s15_s14 = sshll.u32 %s289_s0, 4  ;;  %s243_s15 = smov [#allocation3]   ;;  %s16_s14 = int_to_ptr.hbm [resolvable:$true] %s15_s14 }
   0x3   :  { %s17_s16 = sshll.u32 %s243_s15, 4  ;;  %s28_s19 = sshll.u32 %s290_s1, 4  ;;  %s18_s16 = int_to_ptr.vmem [resolvable:$true] %s17_s16  ;;  %s29_s19 = int_to_ptr.hbm [resolvable:$true] %s28_s19 }
   0x4   :  { %s244_s20 = smov 128   ;;  %s245_s21 = smov 8  }
   0x5   :  { %23 = dma.hbm_to_vmem [thread:$0]  %s16_s14, 256, %s18_s16, [#allocation4], %s244_s20, %s244_s20, %s245_s21  }
   0x6   :  { %s246_s22 = smov [#allocation6]  }
   0x7   :  { %s30_s23 = sshll.u32 %s246_s22, 4  ;;  %s31_s23 = int_to_ptr.vmem [resolvable:$true] %s30_s23 }
   0x8   :  { %36 = dma.hbm_to_vmem [thread:$0]  %s29_s19, 2048, %s31_s23, [#allocation7], %s244_s20, %s244_s20, %s245_s21  }
   0x9   :  { %237 = dma.done.wait [#allocation4], 256  }
   0xa   :  { %238 = vsyncadd [#allocation4], 4294967040 }
   0xb   :  { %239 = dma.done.wait [#allocation7], 2048  }
   0xc   :  { %240 = vsyncadd [#allocation7], 4294965248  ;;  %v88_v0 = vld [vmem:[#allocation6 + $0x78] sm:$0xff]  ;;  %v87_v1 = vld [vmem:[#allocation6 + $0x70] sm:$0xff]  ;;  %s247_s24 = smov [#allocation8]   ;;  %s129_s28 = sshll.u32 %s292_s3, 4  ;;  %s130_s28 = int_to_ptr.hbm [resolvable:$true] %s129_s28 }
   0xd   :  { %89 = vmatpush.xpose.msra.mxu0 %v88_v0  ;;  %143 = vmatpush.xpose.msra.mxu1 %v88_v0  ;;  %v86_v2 = vld [vmem:[#allocation6 + $0x68] sm:$0xff]  ;;  %v85_v3 = vld [vmem:[#allocation6 + $0x60] sm:$0xff]  ;;  %v84_v4 = vld [vmem:[#allocation6 + $0x58] sm:$0xff]  ;;  %s127_s25 = sshll.u32 %s247_s24, 4  ;;  %s128_s25 = int_to_ptr.vmem [resolvable:$true] %s127_s25 }
   0xe   :  { %v83_v5 = vld [vmem:[#allocation6 + $0x50] sm:$0xff]  ;;  %v82_v6 = vld [vmem:[#allocation6 + $0x48] sm:$0xff]  ;;  %v81_v7 = vld [vmem:[#allocation6 + $0x40] sm:$0xff] }
   0xf   :  { %v80_v8 = vld [vmem:[#allocation6 + $0x38] sm:$0xff]  ;;  %v79_v9 = vld [vmem:[#allocation6 + $0x30] sm:$0xff]  ;;  %v78_v10 = vld [vmem:[#allocation6 + $0x28] sm:$0xff] }
  0x10   :  { %v77_v11 = vld [vmem:[#allocation6 + $0x20] sm:$0xff]  ;;  %v76_v12 = vld [vmem:[#allocation6 + $0x18] sm:$0xff]  ;;  %v75_v13 = vld [vmem:[#allocation6 + $0x10] sm:$0xff] }
  0x11   :  { %90 = vmatpush.xpose.msra.mxu0 %v87_v1  ;;  %144 = vmatpush.xpose.msra.mxu1 %v87_v1  ;;  %v74_v14 = vld [vmem:[#allocation6 + $0x8] sm:$0xff]  ;;  %v73_v15 = vld [vmem:[#allocation6] sm:$0xff]  ;;  %v71_v16 = vld [vmem:[#allocation3] sm:$0xff] }
  0x12   :  { %v72_v17 = vld [vmem:[#allocation3 + $0x8] sm:$0xff]  ;;  %v164_v18 = vld [vmem:[%s291_s2] ss:$0 sm:$0xff] }
  0x13   :  { %v65_v19 = vadd.f32 %v164_v18, %v71_v16  ;;  %v66_v20 = vadd.f32 %v164_v18, %v72_v17 }
  0x15   :  { %91 = vmatpush.xpose.msra.mxu0 %v86_v2  ;;  %145 = vmatpush.xpose.msra.mxu1 %v86_v2 }
  0x19   :  { %92 = vmatpush.xpose.msra.mxu0 %v85_v3  ;;  %146 = vmatpush.xpose.msra.mxu1 %v85_v3 }
  0x1d   :  { %93 = vmatpush.xpose.msra.mxu0 %v84_v4  ;;  %147 = vmatpush.xpose.msra.mxu1 %v84_v4 }
  0x21   :  { %94 = vmatpush.xpose.msra.mxu0 %v83_v5  ;;  %148 = vmatpush.xpose.msra.mxu1 %v83_v5 }
  0x25   :  { %95 = vmatpush.xpose.msra.mxu0 %v82_v6  ;;  %149 = vmatpush.xpose.msra.mxu1 %v82_v6 }
  0x29   :  { %96 = vmatpush.xpose.msra.mxu0 %v81_v7  ;;  %150 = vmatpush.xpose.msra.mxu1 %v81_v7 }
  0x2d   :  { %97 = vmatpush.xpose.msra.mxu0 %v80_v8  ;;  %151 = vmatpush.xpose.msra.mxu1 %v80_v8 }
  0x31   :  { %98 = vmatpush.xpose.msra.mxu0 %v79_v9  ;;  %152 = vmatpush.xpose.msra.mxu1 %v79_v9 }
  0x35   :  { %99 = vmatpush.xpose.msra.mxu0 %v78_v10  ;;  %153 = vmatpush.xpose.msra.mxu1 %v78_v10 }
  0x39   :  { %100 = vmatpush.xpose.msra.mxu0 %v77_v11  ;;  %154 = vmatpush.xpose.msra.mxu1 %v77_v11 }
  0x3d   :  { %101 = vmatpush.xpose.msra.mxu0 %v76_v12  ;;  %155 = vmatpush.xpose.msra.mxu1 %v76_v12 }
  0x41   :  { %102 = vmatpush.xpose.msra.mxu0 %v75_v13  ;;  %156 = vmatpush.xpose.msra.mxu1 %v75_v13 }
  0x45   :  { %103 = vmatpush.xpose.msra.mxu0 %v74_v14  ;;  %157 = vmatpush.xpose.msra.mxu1 %v74_v14 }
  0x49   :  { %104 = vmatpush.xpose.msra.mxu0 %v73_v15  ;;  %158 = vmatpush.xpose.msra.mxu1 %v73_v15 }
  0x4c   :  { %105 = vmatmul.f32.vlgmr.msra.gmra.mxu0 %v71_v16  ;;  %108 = vmatmul.f32.vlgmr.msra.gmra.mxu1 %v72_v17 }
  0xc9   :  { %v106_v21 = vpop.f32.mrf.mxu0  ;;  %v109_v22 = vpop.f32.mrf.mxu1 }
  0xca   :  { %v112_v23 = vadd.f32 %v106_v21, %v65_v19  ;;  %v113_v24 = vadd.f32 %v109_v22, %v66_v20 }
  0xcc   :  { %121 = vst [vmem:[#allocation8] sm:$0xff] %v112_v23 }
  0xcd   :  { %122 = vst [vmem:[#allocation8 + $0x8] sm:$0xff] %v113_v24 }
  0xce   :  { %135 = dma.vmem_to_hbm [thread:$0]  %s128_s25, 256, %s130_s28, [#allocation5], %s244_s20, %s244_s20, %s245_s21  }
  0xcf   :  { %241 = dma.done.wait [#allocation5], 256  }
  0xd0   :  { %242 = vsyncadd [#allocation5], 4294967040 }
  0xd1   :  { %140 = vsyncpa [#allocation4], 1 }
  0xd2   :  { %141 = vsyncpa [#allocation7], 1 }
  0xd3   :  { %142 = vsyncpa [#allocation5], 1 }

</bundles_post_ra>
